<compile_context>
chip_gen: v7x
topology: tpu7x:2x2x1
jax: 0.10.0
libtpu: 0.0.40
codegen_flags: <defaults>
</compile_context>

<pallas_src>
from functools import partial

import jax
import jax.numpy as jnp
from jax.experimental import pallas as pl
from jax.experimental.pallas import tpu as pltpu


# ----------------------------------------------------------------------------
# Tiling policy
# ----------------------------------------------------------------------------

_VMEM_BUDGET_BYTES = 20 << 20   # target per-step footprint (blocks + f32 temps)
_VMEM_LIMIT_BYTES = 48 << 20    # raised scoped-VMEM limit (< v7x 64 MiB physical)


def _choose_blocking(B: int, C: int, HW: int, dtype) -> tuple[int, int]:
    """Pick (batch_block, spatial_tile) for a (Bt, C, tile) block."""
    io_bytes = jnp.dtype(dtype).itemsize
    # double-buffered input + double-buffered output + ~3 f32 compute temps
    per_elem = 2 * io_bytes + 2 * io_bytes + 3 * 4
    max_block_elems = max(128, _VMEM_BUDGET_BYTES // (per_elem * C))

    if HW <= max_block_elems:
        # Full-HW tile: each step's DMA is one fully contiguous slab.
        tile = HW
        bt = max(1, min(B, max_block_elems // HW))
        # Keep at least 2 grid steps so both v7x TensorCores get work.
        if bt >= B and B > 1:
            bt = -(-B // 2)            # cdiv(B, 2)
    else:
        # Large feature maps: one batch element per step, lane-dense tile.
        bt = 1
        tile = min(max_block_elems, 8192)
        tile = max(128, (tile // 128) * 128)
    return bt, tile


# ----------------------------------------------------------------------------
# Pallas kernel
# ----------------------------------------------------------------------------

def _layernorm2d_kernel(x_ref, w_ref, b_ref, o_ref, *, eps):
    # x_ref / o_ref: (Bt, C, T) block. Channels -> sublanes, spatial -> lanes.
    # w_ref / b_ref: (C, 1) per-channel affine (broadcast over batch & lanes).
    x = x_ref[...].astype(jnp.float32)
    mu = jnp.mean(x, axis=1, keepdims=True)              # (Bt, 1, T)
    xc = x - mu
    var = jnp.mean(xc * xc, axis=1, keepdims=True)       # biased var (torch .mean)
    inv = jax.lax.rsqrt(var + eps)                       # EUP rsqrt (free slot)
    w = w_ref[...].astype(jnp.float32)                   # (C, 1) -> broadcasts
    b = b_ref[...].astype(jnp.float32)
    o_ref[...] = (xc * inv * w + b).astype(o_ref.dtype)


def layernorm2d(x, weight, bias, *, eps: float = 1e-6):
    """LayerNorm2d: normalize an NCHW tensor over its channel dimension."""
    B, C, H, W = x.shape
    HW = H * W

    x2 = x.reshape(B, C, HW)          # contiguous reshape, native dtype, no transpose
    w2 = weight.reshape(C, 1)
    b2 = bias.reshape(C, 1)

    bt, tile = _choose_blocking(B, C, HW, x.dtype)
    grid = (pl.cdiv(B, bt), pl.cdiv(HW, tile))

    y2 = pl.pallas_call(
        partial(_layernorm2d_kernel, eps=eps),
        out_shape=jax.ShapeDtypeStruct((B, C, HW), x.dtype),
        grid=grid,
        in_specs=[
            pl.BlockSpec((bt, C, tile), lambda b, t: (b, 0, t)),  # activations
            pl.BlockSpec((C, 1), lambda b, t: (0, 0)),            # gamma (resident)
            pl.BlockSpec((C, 1), lambda b, t: (0, 0)),            # beta  (resident)
        ],
        out_specs=pl.BlockSpec((bt, C, tile), lambda b, t: (b, 0, t)),
        compiler_params=pltpu.CompilerParams(
            dimension_semantics=("parallel", "parallel"),
            vmem_limit_bytes=_VMEM_LIMIT_BYTES,
        ),
    )(x2, w2, b2)

    return y2.reshape(B, C, H, W)


# ----------------------------------------------------------------------------
# Pure-JAX reference (mirrors the PyTorch module)
# ----------------------------------------------------------------------------

def _layernorm2d_ref(x, weight, bias, eps=1e-6):
    x = x.astype(jnp.float32)
    u = jnp.mean(x, axis=1, keepdims=True)
    s = jnp.mean((x - u) ** 2, axis=1, keepdims=True)
    xn = (x - u) / jnp.sqrt(s + eps)
    return weight[None, :, None, None] * xn + bias[None, :, None, None]


# ----------------------------------------------------------------------------
# Main
# ----------------------------------------------------------------------------

if __name__ == "__main__":
    B, C, H, W = 2, 4, 16, 16

    key = jax.random.PRNGKey(0)
    kx, kw, kb = jax.random.split(key, 3)
    x = jax.random.normal(kx, (B, C, H, W), jnp.float32)
    # Module default init is weight=1, bias=0; perturb so the affine path is exercised.
    weight = jnp.ones((C,), jnp.float32) + 0.1 * jax.random.normal(kw, (C,), jnp.float32)
    bias = 0.1 * jax.random.normal(kb, (C,), jnp.float32)

    fwd = jax.jit(layernorm2d)

    # float32 path
    y = fwd(x, weight, bias)
    jax.block_until_ready(y)
    y_ref = _layernorm2d_ref(x, weight, bias)
    assert y.shape == (B, C, H, W)
    assert y.dtype == x.dtype
    assert bool(jnp.all(jnp.isfinite(y)))
    max_err = float(jnp.max(jnp.abs(y - y_ref)))
    assert max_err < 1e-4, f"f32 mismatch vs reference: max_err={max_err}"

    # bfloat16 path (native-dtype I/O, f32 stats inside the kernel)
    x_bf = x.astype(jnp.bfloat16)
    y_bf = fwd(x_bf, weight, bias)
    jax.block_until_ready(y_bf)
    assert y_bf.dtype == jnp.bfloat16
    assert bool(jnp.all(jnp.isfinite(y_bf.astype(jnp.float32))))
    y_bf_ref = _layernorm2d_ref(x_bf, weight, bias)
    max_err_bf = float(jnp.max(jnp.abs(y_bf.astype(jnp.float32) - y_bf_ref)))
    assert max_err_bf < 1e-1, f"bf16 mismatch vs reference: max_err={max_err_bf}"

    print("KERNEL_OK")
</pallas_src>

<mosaic_0001>
module attributes {stable_mosaic.version = 11 : i64} {
  func.func @_layernorm2d_kernel(%arg0: i32, %arg1: i32, %arg2: memref<1x4x256xf32, #tpu.memory_space<vmem>>, %arg3: memref<4x1xf32, #tpu.memory_space<vmem>>, %arg4: memref<4x1xf32, #tpu.memory_space<vmem>>, %arg5: memref<1x4x256xf32, #tpu.memory_space<vmem>>) attributes {dimension_semantics = [#tpu.dimension_semantics<parallel>, #tpu.dimension_semantics<parallel>], iteration_bounds = array<i64: 2, 1>, scalar_prefetch = 0 : i64, scratch_operands = 0 : i64, tpu.core_type = #tpu.core_type<tc>, window_params = [{transform_indices = @transform_0, window_bounds = array<i64: 1, 4, 256>}, {pipeline_mode = #tpu.pipeline_mode<synchronous>, transform_indices = @transform_1, window_bounds = array<i64: 4, 1>}, {pipeline_mode = #tpu.pipeline_mode<synchronous>, transform_indices = @transform_2, window_bounds = array<i64: 4, 1>}, {transform_indices = @transform_3, window_bounds = array<i64: 1, 4, 256>}]} {
    %c0 = arith.constant 0 : index
    %c0_0 = arith.constant 0 : index
    %c0_1 = arith.constant 0 : index
    %0 = vector.load %arg2[%c0, %c0_0, %c0_1] : memref<1x4x256xf32, #tpu.memory_space<vmem>>, vector<1x4x256xf32>
    %cst = arith.constant dense<0.000000e+00> : vector<1x256xf32>
    %1 = vector.multi_reduction <add>, %0, %cst [1] : vector<1x4x256xf32> to vector<1x256xf32>
    %2 = vector.shape_cast %1 : vector<1x256xf32> to vector<1x1x256xf32>
    %cst_2 = arith.constant 4.000000e+00 : f32
    %3 = vector.broadcast %cst_2 : f32 to vector<1x1x256xf32>
    %4 = arith.divf %2, %3 : vector<1x1x256xf32>
    %5 = vector.broadcast %4 : vector<1x1x256xf32> to vector<1x4x256xf32>
    %6 = arith.subf %0, %5 : vector<1x4x256xf32>
    %7 = arith.mulf %6, %6 : vector<1x4x256xf32>
    %cst_3 = arith.constant dense<0.000000e+00> : vector<1x256xf32>
    %8 = vector.multi_reduction <add>, %7, %cst_3 [1] : vector<1x4x256xf32> to vector<1x256xf32>
    %9 = vector.shape_cast %8 : vector<1x256xf32> to vector<1x1x256xf32>
    %cst_4 = arith.constant 4.000000e+00 : f32
    %10 = vector.broadcast %cst_4 : f32 to vector<1x1x256xf32>
    %11 = arith.divf %9, %10 : vector<1x1x256xf32>
    %cst_5 = arith.constant 9.99999997E-7 : f32
    %12 = vector.broadcast %cst_5 : f32 to vector<1x1x256xf32>
    %13 = arith.addf %11, %12 : vector<1x1x256xf32>
    %14 = math.rsqrt %13 : vector<1x1x256xf32>
    %c0_6 = arith.constant 0 : index
    %c0_7 = arith.constant 0 : index
    %15 = vector.load %arg3[%c0_6, %c0_7] : memref<4x1xf32, #tpu.memory_space<vmem>>, vector<4x1xf32>
    %c0_8 = arith.constant 0 : index
    %c0_9 = arith.constant 0 : index
    %16 = vector.load %arg4[%c0_8, %c0_9] : memref<4x1xf32, #tpu.memory_space<vmem>>, vector<4x1xf32>
    %17 = vector.broadcast %14 : vector<1x1x256xf32> to vector<1x4x256xf32>
    %18 = arith.mulf %6, %17 : vector<1x4x256xf32>
    %19 = vector.shape_cast %15 : vector<4x1xf32> to vector<1x4x1xf32>
    %20 = vector.broadcast %19 : vector<1x4x1xf32> to vector<1x4x256xf32>
    %21 = arith.mulf %18, %20 : vector<1x4x256xf32>
    %22 = vector.shape_cast %16 : vector<4x1xf32> to vector<1x4x1xf32>
    %23 = vector.broadcast %22 : vector<1x4x1xf32> to vector<1x4x256xf32>
    %24 = arith.addf %21, %23 : vector<1x4x256xf32>
    %c0_10 = arith.constant 0 : index
    %c0_11 = arith.constant 0 : index
    %c0_12 = arith.constant 0 : index
    %25 = vector.load %arg5[%c0_10, %c0_11, %c0_12] : memref<1x4x256xf32, #tpu.memory_space<vmem>>, vector<1x4x256xf32>
    tpu.vector_store %arg5[%c0_10, %c0_11, %c0_12], %24 {strides = array<i32>} : memref<1x4x256xf32, #tpu.memory_space<vmem>>, vector<1x4x256xf32>,
    return
  }
  func.func @transform_0(%arg0: i32, %arg1: i32) -> (i32, i32, i32) {
    %c0_i32 = arith.constant 0 : i32
    %c0_i32_0 = arith.constant 0 : i32
    return %arg0, %c0_i32, %arg1 : i32, i32, i32
  }
  func.func @transform_1(%arg0: i32, %arg1: i32) -> (i32, i32) {
    %c0_i32 = arith.constant 0 : i32
    %c0_i32_0 = arith.constant 0 : i32
    %c0_i32_1 = arith.constant 0 : i32
    return %c0_i32, %c0_i32_0 : i32, i32
  }
  func.func @transform_2(%arg0: i32, %arg1: i32) -> (i32, i32) {
    %c0_i32 = arith.constant 0 : i32
    %c0_i32_0 = arith.constant 0 : i32
    %c0_i32_1 = arith.constant 0 : i32
    return %c0_i32, %c0_i32_0 : i32, i32
  }
  func.func @transform_3(%arg0: i32, %arg1: i32) -> (i32, i32, i32) {
    %c0_i32 = arith.constant 0 : i32
    %c0_i32_0 = arith.constant 0 : i32
    return %arg0, %c0_i32, %arg1 : i32, i32, i32
  }
}

</mosaic_0001>

<bundles_post_ra>
// kernel: layernorm2d.1
= control target key start
LH: loop header
LB: loop body
LE: loop exit
PB: predicated region body
PF: predicated region fallthrough
CT: control target
= control target key end

     0   :  { %s473_s12 = smov 0   ;;  %s475_s13 = smov 0   ;;  %s523_s0 = inlined_call_operand.vmem [shape: f32[2,4,256], index: 0, kind: input, shape index: {}]   ;;  %s524_s1 = inlined_call_operand.vmem [shape: f32[4,1], index: 1, kind: input, shape index: {}]   ;;  %s525_s2 = inlined_call_operand.vmem [shape: f32[4,1], index: 2, kind: input, shape index: {}]   ;;  %s526_s3 = inlined_call_operand.vmem [shape: f32[2,4,256], index: 3, kind: output, shape index: {}]  }
   0x1   :  { %s477_s14 = smov 0  }
   0x2 LB: > { %s25_s15 = sadd.s32 1, %s445_s13  ;;  %p386_p0 = scmp.ge.s32.totalorder %s449_s14, 1  ;;  %s449_s14 = sphi %s477_s14, %s13_s14   ;;  %s445_s13 = sphi %s475_s13, %s528_s13   ;;  %s441_s12 = sphi %s473_s12, %s527_s12  }
   0x3   : > { %p27_p1 = scmp.ge.s32.totalorder %s25_s15, 2  ;;  %p158_p2 = scmp.lt.s32.totalorder %s449_s14, 3 }
   0x5   : > { %s530_s15 = smov (%p27_p1, %s25_s15), 0  ;;  %p159_p3 = pnand %p386_p0, %p158_p2 }
   0x6   : > { %v261_v0 = vld [vmem:[%s524_s1] sm:$0xf] (!%p159_p3)  ;;  %v451_v1 = vmov (!%p159_p3), 0   ;;  %p191_p4 = scmp.lt.s32.totalorder (!%p159_p3), %s441_s12, 1  ;;  %vm214_vm0 = vcmask (!%p159_p3), 1043456   ;;  %v275_v45 = vlaneseq (!%p159_p3) }
   0x7   : > { %162 = sbr.rel (%p159_p3) target bundleno = 145 (0x91), region = 32  ;;  %421 = vset.pattern.permute.xlu0 (!%p159_p3), %v451_v1  ;;  %v262_v2 = vld [vmem:[%s525_s2] sm:$0xf] (!%p159_p3)  ;;  %v452_v43 = vmov (!%p159_p3), 839922192  }
   0x8   : > { %270 = vperm.xlu0 (!%p159_p3), %421, %v261_v0   ;;  %v273_v44 = vunpack.c.l.s4 (!%p159_p3), %v452_v43  ;;  %v276_v48 = vshrl.u32 (!%p159_p3), %v275_v45, 7 }
   0xa   : > { %v274_v47 = vunpack.c.0.s8 (!%p159_p3), %v273_v44 }
   0xc   : > { %283 = vperm.xlu0 (!%p159_p3), %421, %v262_v2   ;;  %v277_v50 = vsub.s32 (!%p159_p3), %v274_v47, %v276_v48 }
   0xe   : > { %s532_s12 = smov (!%p191_p4, %s441_s12), 1 }
   0xf   : > { %s393_s20 = sshll.u32 %s532_s12, 3 }
  0x10   : > { %s198_s23 = scalar_lea.vmem %s523_s0, %s393_s20  ;;  %s208_s26 = scalar_lea.vmem %s526_s3, %s393_s20 }
  0x11   : > { %v210_v3 = vld [vmem:[%s198_s23] sm:$0xff] }
  0x12   : > { %v212_v4 = vcombine.high %v210_v3, %v210_v3  ;;  %v215_v5 = vsel %vm214_vm0, %v210_v3, 0.0 }
  0x13   : > { %v216_v7 = vrot.slane %v215_v5, 4 }
  0x14   : > { %v222_v6 = vsel %vm214_vm0, %v212_v4, 0.0 }
  0x15   : > { %v223_v8 = vrot.slane %v222_v6, 4  ;;  %v217_v9 = vadd.f32 %v216_v7, %v215_v5 }
  0x17   : > { %v224_v10 = vadd.f32 %v223_v8, %v222_v6  ;;  %v218_v11 = vrot.slane %v217_v9, 2 }
  0x19   : > { %v225_v12 = vrot.slane %v224_v10, 2  ;;  %v219_v13 = vadd.f32 %v218_v11, %v217_v9 }
  0x1b   : > { %v226_v14 = vadd.f32 %v225_v12, %v224_v10  ;;  %v220_v15 = vrot.slane %v219_v13, 1 }
  0x1d   : > { %v227_v16 = vrot.slane %v226_v14, 1  ;;  %v221_v17 = vadd.f32 %v220_v15, %v219_v13 }
  0x1f   : > { %v228_v18 = vadd.f32 %v227_v16, %v226_v14  ;;  %v230_v19 = vmul.f32 0.25, %v221_v17 }
  0x21   : > { %v231_v20 = vmul.f32 0.25, %v228_v18 }
  0x23   : > { %v234_v21 = vcombine.low %v230_v19, %v231_v20 }
  0x25   : > { %v236_v22 = vsub.f32 %v210_v3, %v234_v21 }
  0x27   : > { %v237_v23 = vmul.f32 %v236_v22, %v236_v22 }
  0x29   : > { %v239_v24 = vcombine.high %v237_v23, %v237_v23  ;;  %v241_v25 = vsel %vm214_vm0, %v237_v23, 0.0 }
  0x2a   : > { %v242_v27 = vrot.slane %v241_v25, 4 }
  0x2b   : > { %v248_v26 = vsel %vm214_vm0, %v239_v24, 0.0 }
  0x2c   : > { %v249_v28 = vrot.slane %v248_v26, 4  ;;  %v243_v29 = vadd.f32 %v242_v27, %v241_v25 }
  0x2e   : > { %v250_v30 = vadd.f32 %v249_v28, %v248_v26  ;;  %v244_v31 = vrot.slane %v243_v29, 2 }
  0x30   : > { %v251_v32 = vrot.slane %v250_v30, 2  ;;  %v245_v33 = vadd.f32 %v244_v31, %v243_v29 }
  0x32   : > { %v252_v34 = vadd.f32 %v251_v32, %v250_v30  ;;  %v246_v35 = vrot.slane %v245_v33, 1 }
  0x34   : > { %v253_v36 = vrot.slane %v252_v34, 1  ;;  %v247_v37 = vadd.f32 %v246_v35, %v245_v33 }
  0x36   : > { %v254_v38 = vadd.f32 %v253_v36, %v252_v34  ;;  %v255_v39 = vmul.f32 0.25, %v247_v37 }
  0x38   : > { %v256_v40 = vmul.f32 0.25, %v254_v38  ;;  %v257_v41 = vadd.f32 1e-06, %v255_v39 }
  0x3a   : > { %v258_v42 = vadd.f32 1e-06, %v256_v40  ;;  %423 = vrsqrt.f32 %v257_v41 }
  0x3c   : > { %425 = vrsqrt.f32 %v258_v42 }
  0x44   : > { %v424_v46 = vpop.eup %423 }
  0x46   : > { %v426_v49 = vpop.eup %425 }
  0x47   : > { %v265_v51 = vcombine.low %v424_v46, %v426_v49 }
  0x49   : > { %v267_v53 = vmul.f32 %v265_v51, %v236_v22 }
  0x87   : > { %v271_v52 = vpop.permute.xlu0 %270 }
  0x88   : > { %v278_v54 = vrot.slane %v271_v52, %v277_v50 }
  0x8a   : > { %v280_v56 = vmul.f32 %v278_v54, %v267_v53 }
  0x8b   : > { %v284_v55 = vpop.permute.xlu0 %283 }
  0x8c   : > { %v291_v57 = vrot.slane %v284_v55, %v277_v50 }
  0x8e   : > { %v293_v58 = vadd.f32 %v291_v57, %v280_v56 }
  0x90   : > { %294 = vst [vmem:[%s208_s26] sm:$0xff] %v293_v58 }
  0x91 PF: > { %s13_s14 = sadd.s32 1, %s449_s14   ;;  %s527_s12 = smov %s445_s13 }
  0x92   : > { %p10_p5 = scmp.ge.s32.totalorder %s13_s14, 4   ;;  %s528_s13 = smov %s530_s15 }
  0x94   :  { %12 = sbr.rel (!%p10_p5) target bundleno = 2 (0x2), region = 62 }

</bundles_post_ra>
